<compile_context>
chip_gen: v7x
topology: tpu7x:2x2x1
jax: 0.10.0
libtpu: 0.0.40
codegen_flags: <defaults>
</compile_context>

<pallas_src>
import math

import jax
import jax.numpy as jnp
from jax.experimental import pallas as pl
from jax.experimental.pallas import tpu as pltpu


# ----------------------------------------------------------------------------
# Kernels
# ----------------------------------------------------------------------------
def _pe2d_kernel_padded(er_ref, ec_ref, x_ref, o_ref):
    # er_ref: (TI, K)  row encoding, zeros in channels [K//2:]
    # ec_ref: (TJ, K)  col encoding, zeros in channels [:K//2]
    # x_ref / o_ref: (TI, TJ, K) tile of the current batch element.
    o_ref[...] = (
        x_ref[...]
        + er_ref[...][:, None, :]   # varies along i, broadcast over j
        + ec_ref[...][None, :, :]   # varies along j, broadcast over i
    )


def _pe2d_kernel_split(er_ref, ec_ref, x_ref, o_ref):
    # er_ref: (TI, K//2), ec_ref: (TJ, K//2); x_ref / o_ref: (TI, TJ, K).
    # Requires K//2 % 128 == 0 so both half-K stores are lane-tile aligned.
    kh = er_ref.shape[-1]
    o_ref[:, :, :kh] = x_ref[:, :, :kh] + er_ref[...][:, None, :]
    o_ref[:, :, kh:] = x_ref[:, :, kh:] + ec_ref[...][None, :, :]


# ----------------------------------------------------------------------------
# Tile selection
# ----------------------------------------------------------------------------
def _sublane(itemsize):
    # Native second-minor tile per dtype width: f32 -> 8, bf16 -> 16, int8/fp8 -> 32.
    return {4: 8, 2: 16, 1: 32}.get(itemsize, 8)


def _tile_candidates(L, sub):
    """Multiples of the native sublane that divide L (ascending).
    Falls back to the full dimension (always a legal block) if none exist."""
    cands = [d for d in range(sub, L + 1, sub) if L % d == 0]
    if not cands:
        cands = [L]
    return sorted(cands)


def _pick_tiles(B, L, K, itemsize, budget_bytes, min_parallel_steps):
    """Pick (TI, TJ): largest contiguous j-slab first, then largest TI, with one
    (TI, TJ, K) block under budget_bytes; then shrink (TI first) until there are
    at least min_parallel_steps grid steps for megacore sharding."""
    cands = _tile_candidates(L, _sublane(itemsize))

    ti = tj = cands[0]
    found = False
    for cj in reversed(cands):               # prefer TJ large: contiguous row slabs
        for ci in reversed(cands):
            if ci * cj * K * itemsize <= budget_bytes:
                ti, tj = ci, cj
                found = True
                break
        if found:
            break
    # If nothing fits the budget we keep the smallest legal tile.

    def steps(a, b):
        return B * (L // a) * (L // b)

    while steps(ti, tj) < min_parallel_steps:
        smaller_i = [c for c in cands if c < ti]
        if smaller_i:
            ti = max(smaller_i)
            continue
        smaller_j = [c for c in cands if c < tj]
        if smaller_j:
            tj = max(smaller_j)
            continue
        break
    return ti, tj


# ----------------------------------------------------------------------------
# Wrapper
# ----------------------------------------------------------------------------
def positional_encoding_2d(
    x,
    idx_s,
    div_term,
    *,
    vmem_limit_bytes=48 * 1024 * 1024,   # safe on v5e/v6e/v7x (v7x: 64 MiB physical)
    block_budget_bytes=None,             # per x/out block; derived from the limit if None
    min_parallel_steps=4,                # keep both v7x TensorCores fed even when B == 1
):
    """x: (B, L, L, K); idx_s: (B, L); div_term: (K//4,). Returns x + pe (eval-mode dropout)."""
    B, L, L2, K = x.shape
    assert L == L2, "x must be (B, L, L, K)"
    assert K % 4 == 0, "d_model (K) must be a multiple of 4"
    Kq, Kh = K // 4, K // 2
    assert div_term.shape == (Kq,)

    # ---- tiny sin/cos precompute in plain JAX (hoisted out of the streaming kernel)
    sin_inp = (idx_s.astype(jnp.float32)[:, :, None]
               * div_term.astype(jnp.float32)[None, None, :])              # (B, L, Kq)
    emb = jnp.concatenate([jnp.sin(sin_inp), jnp.cos(sin_inp)], -1).astype(x.dtype)  # (B, L, Kh)

    itemsize = jnp.dtype(x.dtype).itemsize
    if block_budget_bytes is None:
        # 2 double-buffered x blocks + 2 double-buffered out blocks must fit,
        # with headroom for the encoding blocks and Mosaic internal scratch.
        block_budget_bytes = min(10 * 1024 * 1024,
                                 max(64 * 1024, (vmem_limit_bytes - 8 * 1024 * 1024) // 4))

    TI, TJ = _pick_tiles(B, L, K, itemsize, block_budget_bytes, min_parallel_steps)
    grid = (B, L // TI, L // TJ)

    split = (Kh % 128 == 0)
    if split:
        # Lane-aligned half-K writes: no zero padding, half the encoding traffic.
        er, ec, kc = emb, emb, Kh
        kernel = _pe2d_kernel_split
        flops = B * L * L * K          # one add per element
    else:
        zeros = jnp.zeros((B, L, Kh), dtype=emb.dtype)
        er = jnp.concatenate([emb, zeros], axis=-1)                         # (B, L, K)
        ec = jnp.concatenate([zeros, emb], axis=-1)                         # (B, L, K)
        kc = K
        kernel = _pe2d_kernel_padded
        flops = 2 * B * L * L * K      # two adds per element (one is with zero)

    cost = pl.CostEstimate(
        flops=flops,
        transcendentals=0,
        bytes_accessed=2 * B * L * L * K * itemsize,   # stream x in + out
    )

    return pl.pallas_call(
        kernel,
        out_shape=jax.ShapeDtypeStruct((B, L, L, K), x.dtype),
        grid_spec=pltpu.PrefetchScalarGridSpec(
            num_scalar_prefetch=0,
            grid=grid,                                                       # (B, i, j), j innermost
            in_specs=[
                pl.BlockSpec((None, TI, kc), lambda b, i, j: (b, i, 0)),     # row enc: i only (no re-DMA over j)
                pl.BlockSpec((None, TJ, kc), lambda b, i, j: (b, j, 0)),     # col enc: j only (tiny)
                pl.BlockSpec((None, TI, TJ, K), lambda b, i, j: (b, i, j, 0)),
            ],
            out_specs=pl.BlockSpec((None, TI, TJ, K), lambda b, i, j: (b, i, j, 0)),
        ),
        input_output_aliases={2: 0},  # in-place update of x's buffer when donated
        compiler_params=pltpu.CompilerParams(
            dimension_semantics=("parallel", "parallel", "parallel"),
            vmem_limit_bytes=vmem_limit_bytes,
        ),
        cost_estimate=cost,
    )(er, ec, x)


# ----------------------------------------------------------------------------
# Reference + demo
# ----------------------------------------------------------------------------
def _reference(x, idx_s, div_term):
    """Pure-JAX reference mirroring the PyTorch forward (eval mode)."""
    B, L, _, K = x.shape
    Kh = K // 2
    sin_inp = idx_s[:, :, None] * div_term[None, None, :]                    # (B, L, Kq)
    emb = jnp.concatenate([jnp.sin(sin_inp), jnp.cos(sin_inp)], -1)          # (B, L, Kh)
    pe_row = jnp.broadcast_to(emb[:, :, None, :], (B, L, L, Kh))
    pe_col = jnp.broadcast_to(emb[:, None, :, :], (B, L, L, Kh))
    pe = jnp.concatenate([pe_row, pe_col], axis=-1).astype(x.dtype)
    return x + pe


def _make_div_term(d_model):
    d_model_half = d_model // 2
    return jnp.exp(
        jnp.arange(0.0, d_model_half, 2.0, dtype=jnp.float32)
        * (-(math.log(10000.0) / d_model_half))
    )  # shape (d_model // 4,)


def _run_case(key, B, L, d_model):
    div_term = _make_div_term(d_model)
    kx, ki = jax.random.split(key)
    x = jax.random.normal(kx, (B, L, L, d_model), dtype=jnp.float32)
    idx_s = jax.random.randint(ki, (B, L), 0, 100).astype(jnp.float32)

    # Reference computed before the kernel call (x is aliased into the output).
    ref = _reference(x, idx_s, div_term)

    out = positional_encoding_2d(x, idx_s, div_term)
    out = jax.block_until_ready(out)

    assert out.shape == ref.shape and out.dtype == ref.dtype
    assert jnp.allclose(out, ref, atol=1e-5, rtol=1e-5), (
        f"mismatch vs reference for (B={B}, L={L}, K={d_model})")


if __name__ == "__main__":
    key = jax.random.PRNGKey(0)
    k1, k2 = jax.random.split(key)

    # Small shape consistent with the module (padded full-K path, K % 128 != 0).
    _run_case(k1, B=2, L=8, d_model=32)

    # Exercise the lane-aligned half-K path (K//2 % 128 == 0) and TI < L tiling.
    _run_case(k2, B=1, L=16, d_model=256)

    print("KERNEL_OK")
</pallas_src>

<mosaic_0001>
module attributes {stable_mosaic.version = 11 : i64} {
  func.func @_pe2d_kernel_padded(%arg0: i32, %arg1: i32, %arg2: i32, %arg3: memref<1x8x32xf32, #tpu.memory_space<vmem>>, %arg4: memref<1x8x32xf32, #tpu.memory_space<vmem>>, %arg5: memref<1x8x8x32xf32, #tpu.memory_space<vmem>>, %arg6: memref<1x8x8x32xf32, #tpu.memory_space<vmem>>) attributes {dimension_semantics = [#tpu.dimension_semantics<parallel>, #tpu.dimension_semantics<parallel>, #tpu.dimension_semantics<parallel>], iteration_bounds = array<i64: 2, 1, 1>, scalar_prefetch = 0 : i64, scratch_operands = 0 : i64, tpu.core_type = #tpu.core_type<tc>, window_params = [{transform_indices = @transform_0, window_bounds = array<i64: 1, 8, 32>}, {transform_indices = @transform_1, window_bounds = array<i64: 1, 8, 32>}, {transform_indices = @transform_2, window_bounds = array<i64: 1, 8, 8, 32>}, {transform_indices = @transform_3, window_bounds = array<i64: 1, 8, 8, 32>}]} {
    %c0 = arith.constant 0 : index
    %c0_0 = arith.constant 0 : index
    %c0_1 = arith.constant 0 : index
    %c0_2 = arith.constant 0 : index
    %0 = vector.load %arg5[%c0, %c0_0, %c0_1, %c0_2] : memref<1x8x8x32xf32, #tpu.memory_space<vmem>>, vector<1x8x8x32xf32>
    %1 = vector.shape_cast %0 : vector<1x8x8x32xf32> to vector<8x8x32xf32>
    %c0_3 = arith.constant 0 : index
    %c0_4 = arith.constant 0 : index
    %c0_5 = arith.constant 0 : index
    %2 = vector.load %arg3[%c0_3, %c0_4, %c0_5] : memref<1x8x32xf32, #tpu.memory_space<vmem>>, vector<1x8x32xf32>
    %3 = vector.shape_cast %2 : vector<1x8x32xf32> to vector<8x32xf32>
    %4 = vector.shape_cast %3 : vector<8x32xf32> to vector<8x1x32xf32>
    %5 = vector.broadcast %4 : vector<8x1x32xf32> to vector<8x8x32xf32>
    %6 = arith.addf %1, %5 : vector<8x8x32xf32>
    %c0_6 = arith.constant 0 : index
    %c0_7 = arith.constant 0 : index
    %c0_8 = arith.constant 0 : index
    %7 = vector.load %arg4[%c0_6, %c0_7, %c0_8] : memref<1x8x32xf32, #tpu.memory_space<vmem>>, vector<1x8x32xf32>
    %8 = vector.shape_cast %7 : vector<1x8x32xf32> to vector<8x32xf32>
    %9 = vector.shape_cast %8 : vector<8x32xf32> to vector<1x8x32xf32>
    %10 = vector.broadcast %9 : vector<1x8x32xf32> to vector<8x8x32xf32>
    %11 = arith.addf %6, %10 : vector<8x8x32xf32>
    %c0_9 = arith.constant 0 : index
    %c0_10 = arith.constant 0 : index
    %c0_11 = arith.constant 0 : index
    %c0_12 = arith.constant 0 : index
    %12 = vector.load %arg6[%c0_9, %c0_10, %c0_11, %c0_12] : memref<1x8x8x32xf32, #tpu.memory_space<vmem>>, vector<1x8x8x32xf32>
    %13 = vector.shape_cast %12 : vector<1x8x8x32xf32> to vector<8x8x32xf32>
    %14 = vector.shape_cast %11 : vector<8x8x32xf32> to vector<1x8x8x32xf32>
    tpu.vector_store %arg6[%c0_9, %c0_10, %c0_11, %c0_12], %14 {strides = array<i32>} : memref<1x8x8x32xf32, #tpu.memory_space<vmem>>, vector<1x8x8x32xf32>,
    return
  }
  func.func @transform_0(%arg0: i32, %arg1: i32, %arg2: i32) -> (i32, i32, i32) {
    %c0_i32 = arith.constant 0 : i32
    %c0_i32_0 = arith.constant 0 : i32
    return %arg0, %arg1, %c0_i32 : i32, i32, i32
  }
  func.func @transform_1(%arg0: i32, %arg1: i32, %arg2: i32) -> (i32, i32, i32) {
    %c0_i32 = arith.constant 0 : i32
    %c0_i32_0 = arith.constant 0 : i32
    return %arg0, %arg2, %c0_i32 : i32, i32, i32
  }
  func.func @transform_2(%arg0: i32, %arg1: i32, %arg2: i32) -> (i32, i32, i32, i32) {
    %c0_i32 = arith.constant 0 : i32
    %c0_i32_0 = arith.constant 0 : i32
    return %arg0, %arg1, %arg2, %c0_i32 : i32, i32, i32, i32
  }
  func.func @transform_3(%arg0: i32, %arg1: i32, %arg2: i32) -> (i32, i32, i32, i32) {
    %c0_i32 = arith.constant 0 : i32
    %c0_i32_0 = arith.constant 0 : i32
    return %arg0, %arg1, %arg2, %c0_i32 : i32, i32, i32, i32
  }
}

</mosaic_0001>

<bundles_post_ra>
// kernel: tpu_custom_call.1
= control target key start
LH: loop header
LB: loop body
LE: loop exit
PB: predicated region body
PF: predicated region fallthrough
CT: control target
= control target key end

     0   :  { %8 = vsyncpa [#allocation3], 0  ;;  %s973_s0 = inlined_call_operand.vmem [shape: f32[2,8,32], index: 0, kind: input, shape index: {}]   ;;  %s974_s1 = inlined_call_operand.vmem [shape: f32[2,8,32], index: 1, kind: input, shape index: {}]   ;;  %s975_s2 = inlined_call_operand.hbm [shape: f32[2,8,8,32], index: 2, kind: input, shape index: {}, may-alias: {2,3}]   ;;  %s976_s3 = inlined_call_operand.hbm [shape: f32[2,8,8,32], index: 3, kind: output, shape index: {}, may-alias: {2,3}]  }
   0x1   :  { %10 = vsyncpa [#allocation3 + $0x1], 0 }
   0x2   :  { %11 = vsyncpa [#allocation4], 0 }
   0x3   :  { %13 = vsyncpa [#allocation4 + $0x1], 0  ;;  %s768_s12 = smov 0   ;;  %s770_s13 = smov 0  }
   0x4   :  { %s772_s14 = smov 0   ;;  %s774_s15 = smov 0  }
   0x5   :  { %s776_s16 = smov 0   ;;  %s778_s17 = smov 0  }
   0x6 LB: > { %s541_s18 = sadd.s32 4294967295, %s739_s17   ;;  %s542_s19 = sadd.s32 4294967294, %s739_s17   ;;  %s739_s17 = sphi %s778_s17, %s19_s17   ;;  %s735_s16 = sphi %s776_s16, %s991_s16   ;;  %s731_s15 = sphi %s774_s15, %s990_s15   ;;  %s727_s14 = sphi %s772_s14, %s989_s14   ;;  %s723_s13 = sphi %s770_s13, %s988_s13   ;;  %s719_s12 = sphi %s768_s12, %s987_s12  }
   0x7   : > { %s38_s20 = sadd.s32 1, %s735_s16  ;;  %s105_s21 = sadd.s32 1, %s727_s14 }
   0x8   : > { %p40_p0 = scmp.ge.s32.totalorder %s38_s20, 2  ;;  %p112_p1 = scmp.ne.s32.totalorder %s727_s14, %s723_s13 }
   0x9   : > { %p113_p2 = scmp.eq.s32.totalorder %s739_s17, 0  ;;  %p118_p3 = scmp.ne.s32.totalorder %s723_s13, %s719_s12 }
   0xa   : > { %s993_s20 = smov (%p40_p0, %s38_s20), 0  ;;  %p119_p5 = scmp.eq.s32.totalorder %s541_s18, 0 }
   0xb   : > { %p809_p4 = por %p113_p2, %p112_p1  ;;  %s98_s23 = ssub.s32 %s735_s16, %s993_s20 }
   0xc   : > { %p146_p6 = scmp.eq.s32.totalorder %s541_s18, 1  ;;  %p103_p7 = scmp.eq.s32.totalorder %s98_s23, 0 }
   0xd   : > { %p815_p8 = por %p119_p5, %p118_p3  ;;  %p152_p10 = scmp.eq.s32.totalorder %s542_s19, 1 }
   0xe   : > { %p819_p9 = por %p146_p6, %p112_p1  ;;  %p572_p13 = scmp.lt.s32.totalorder %s739_s17, 2 }
   0xf   : > { %s824_s26 = scalar_select %p103_p7, %s727_s14, %s105_s21  }
  0x10   : > { %s980_s25 = scalar_select %p819_p9, 1, 0 }
  0x11   : > { %p826_p11 = por %p152_p10, %p118_p3  ;;  %s192_s28 = sand.u32 1, %s727_s14  }
  0x12   : > { %s545_s29 = sshll.u32 %s192_s28, 6  ;;  %s558_s30 = sshll.u32 %s735_s16, 10 }
  0x13   : > { %s981_s27 = scalar_select %p826_p11, 1, 0 }
  0x14   : > { %s837_s6 = scalar_lea.hbm %s975_s2, %s558_s30  ;;  %s196_s7 = scalar_lea.vmem [#allocation2], %s545_s29 }
  0x15   : > { %s206_s8 = sshll.u32 %s196_s7, 4  ;;  %p843_p0 = pnand %p572_p13, %p809_p4  ;;  %s839_s8 = int_to_ptr.vmem [resolvable:$true] %s206_s8 }
  0x16   : > { %s848_s10 = scalar_lea.sflag [#allocation3], %s192_s28  ;;  %s627_s11 = scalar_lea.hbm %s837_s6, 1024 }
  0x17   : > { %p628_p2 = scmp.ne.s32.totalorder %s837_s6, %s627_s11  ;;  %p629_p3 = pneg %p843_p0 }
  0x18   : > { %s632_s21 = scalar_lea.hbm %s975_s2, 2048  ;;  %p633_p4 = scmp.lt.u32.totalorder %s837_s6, %s975_s2 }
  0x19   : > { %p630_p5 = pnand %p629_p3, %p628_p2  ;;  %p634_p7 = scmp.lt.u32.totalorder %s632_s21, %s627_s11 }
  0x1a   : > { %p636_p13 = scmp.lt.u32.totalorder %s627_s11, %s837_s6 }
  0x1b   : > { %p631_p6 = pneg %p630_p5  ;;  %p635_p10 = por %p634_p7, %p633_p4 }
  0x1d   : > { %p637_p12 = por %p636_p13, %p635_p10 }
  0x1f   : > { %p638_p1 = pnand %p637_p12, %p631_p6 }
  0x21   : > { %641 = shalt.err (!%p638_p1)
}
  0x22   : > { %s642_s28 = scalar_lea.vmem %s839_s8, 1024  ;;  %s741_s29 = smov [#allocation2]  }
  0x23   : > { %p643_p2 = scmp.ne.s32.totalorder %s839_s8, %s642_s28  ;;  %s647_s30 = sshll.u32 %s741_s29, 4  ;;  %s648_s30 = int_to_ptr.vmem [resolvable:$false] %s647_s30 }
  0x24   : > { %s649_s4 = scalar_lea.vmem %s648_s30, 2048  ;;  %p650_p9 = scmp.lt.s32.totalorder %s839_s8, %s648_s30 }
  0x25   : > { %p645_p5 = pnand %p643_p2, %p629_p3  ;;  %p651_p4 = scmp.lt.s32.totalorder %s649_s4, %s642_s28 }
  0x27   : > { %p646_p11 = pneg %p645_p5  ;;  %p652_p7 = por %p651_p4, %p650_p9 }
  0x29   : > { %p653_p10 = pnand %p652_p7, %p646_p11 }
  0x2b   : > { %656 = shalt.err (!%p653_p10)
}
  0x2c   : > { %s742_s5 = smov 128   ;;  %s743_s7 = smov 8  }
  0x2d   : > { %567 = dma.hbm_to_vmem [thread:$0]  (!%p843_p0), %s837_s6, 1024, %s839_s8, %s848_s10, %s742_s5, %s742_s5, %s743_s7  }
  0x2e   : > { %p214_p12 = scmp.lt.s32.totalorder %s739_s17, 3  ;;  %p983_p1 = scmp.ge.s32.totalorder %s739_s17, 1 }
  0x30   : > { %p215_p3 = pnand %p983_p1, %p214_p12 }
  0x31   : > { %s880_s11 = sand.u32 (!%p215_p3), 1, %s723_s13  }
  0x32   : > { %218 = sbr.rel (%p215_p3) target bundleno = 97 (0x61), region = 32  ;;  %s549_s18 = sshll.u32 (!%p215_p3), %s880_s11, 6 }
  0x33   : > { %s221_s19 = scalar_lea.sflag (!%p215_p3), [#allocation3], %s880_s11  ;;  %s886_s21 = scalar_lea.vmem (!%p215_p3), [#allocation2], %s549_s18 }
  0x39   : > { %710 = dma.done.wait (%p815_p8), %s221_s19, 1024  }
  0x3a   : > { %712 = vsyncadd (%p815_p8), %s221_s19, 4294966272  ;;  %p261_p9 = scmp.lt.s32.totalorder %s731_s15, 1  ;;  %v291_v0 = vlaneseq  ;;  %v744_v1 = vmov 1966171168   ;;  %v277_v13 = vld [vmem:[%s886_s21] sm:$0xff]  ;;  %v278_v19 = vld [vmem:[%s886_s21 + $0x8] sm:$0xff] }
  0x3b   : > { %v289_v2 = vunpack.c.l.s4 %v744_v1  ;;  %v279_v20 = vld [vmem:[%s886_s21 + $0x10] sm:$0xff]  ;;  %v281_v26 = vld [vmem:[%s886_s21 + $0x20] sm:$0xff]  ;;  %vm393_vm0 = vcmask 261120   ;;  %v280_v27 = vld [vmem:[%s886_s21 + $0x18] sm:$0xff]  ;;  %s260_s29 = scalar_lea.vmem [#allocation5], %s549_s18  ;;  %s559_s4 = sshll.u32 %s731_s15, 10 }
  0x3c   : > { %s262_s6 = scalar_select %p261_p9, %s731_s15, 1  ;;  %v292_v3 = vshrl.u32 %v291_v0, 7  ;;  %v282_v35 = vld [vmem:[%s886_s21 + $0x28] sm:$0xff]  ;;  %v283_v36 = vld [vmem:[%s886_s21 + $0x30] sm:$0xff]  ;;  %v284_v44 = vld [vmem:[%s886_s21 + $0x38] sm:$0xff] }
  0x3d   : > { %v290_v4 = vunpack.c.0.s8 %v289_v2  ;;  %s419_s30 = sshll.u32 %s260_s29, 4  ;;  %s921_s7 = scalar_lea.hbm %s976_s3, %s559_s4  ;;  %s915_s30 = int_to_ptr.vmem [resolvable:$true] %s419_s30 }
  0x3e   : > { %s551_s8 = sshll.u32 %s262_s6, 3  ;;  %v338_v8 = vsub.s32 0, %v292_v3  ;;  %s403_s18 = scalar_lea.sflag [#allocation4], %s880_s11 }
  0x3f   : > { %s267_s22 = scalar_lea.vmem %s973_s0, %s551_s8  ;;  %v293_v5 = vsub.s32 %v290_v4, %v292_v3  ;;  %s274_s28 = scalar_lea.vmem %s974_s1, %s551_s8 }
  0x40   : > { %v285_v6 = vld [vmem:[%s267_s22] sm:$0xff]  ;;  %s657_s19 = scalar_lea.vmem %s915_s30, 1024  ;;  %p984_p11 = scmp.ne.s32.totalorder %s980_s25, 0 }
  0x41   : > { %v294_v7 = vrot.slane %v285_v6, %v293_v5  ;;  %v287_v9 = vcombine.high %v285_v6, %v285_v6  ;;  %v384_v18 = vld [vmem:[%s274_s28] sm:$0xff]  ;;  %p658_p8 = scmp.ne.s32.totalorder %s915_s30, %s657_s19  ;;  %s745_s21 = smov [#allocation5]  }
  0x42   : > { %s661_s6 = sshll.u32 %s745_s21, 4  ;;  %s662_s6 = int_to_ptr.vmem [resolvable:$false] %s661_s6 }
  0x43   : > { %v310_v10 = vrot.slane %v294_v7, %v293_v5  ;;  %v302_v11 = vcombine.high %v294_v7, %v294_v7  ;;  %v301_v12 = vrot.slane %v287_v9, %v293_v5  ;;  %p659_p0 = pnand %p658_p8, %p984_p11  ;;  %s663_s8 = scalar_lea.vmem %s662_s6, 2048 }
  0x44   : > { %p664_p13 = scmp.lt.s32.totalorder %s915_s30, %s662_s6  ;;  %p665_p2 = scmp.lt.s32.totalorder %s663_s8, %s657_s19 }
  0x45   : > { %v339_v14 = vrot.slane %v310_v10, %v338_v8  ;;  %v324_v15 = vrot.slane %v302_v11, %v293_v5  ;;  %v332_v16 = vcombine.high %v310_v10, %v310_v10  ;;  %v317_v17 = vrot.slane %v301_v12, %v293_v5  ;;  %p660_p6 = pneg %p659_p0 }
  0x46   : > { %v303_v21 = vcombine.high %v301_v12, %v301_v12  ;;  %p666_p5 = por %p665_p2, %p664_p13 }
  0x47   : > { %v376_v22 = vadd.f32 %v339_v14, %v277_v13  ;;  %v343_v23 = vrot.slane %v324_v15, %v338_v8  ;;  %v347_v24 = vrot.slane %v332_v16, %v338_v8  ;;  %v334_v25 = vcombine.high %v324_v15, %v324_v15 }
  0x48   : > { %v355_v28 = vrot.slane %v317_v17, %v338_v8  ;;  %v331_v29 = vrot.slane %v303_v21, %v293_v5  ;;  %v333_v30 = vcombine.high %v317_v17, %v317_v17  ;;  %p667_p4 = pnand %p666_p5, %p660_p6 }
  0x49   : > { %v385_v31 = vadd.f32 %v384_v18, %v376_v22  ;;  %v377_v32 = vadd.f32 %v343_v23, %v278_v19  ;;  %v378_v33 = vadd.f32 %v347_v24, %v279_v20  ;;  %v351_v34 = vrot.slane %v334_v25, %v338_v8 }
  0x4a   : > { %v380_v37 = vadd.f32 %v355_v28, %v281_v26  ;;  %v359_v38 = vrot.slane %v331_v29, %v338_v8  ;;  %v363_v39 = vrot.slane %v333_v30, %v338_v8  ;;  %v335_v40 = vcombine.high %v331_v29, %v331_v29 }
  0x4b   : > { %394 = vst.msk [vmem:[%s260_s29] sm:$0xff] %vm393_vm0, %v385_v31  ;;  %v386_v41 = vadd.f32 %v384_v18, %v377_v32  ;;  %v387_v42 = vadd.f32 %v384_v18, %v378_v33  ;;  %v379_v43 = vadd.f32 %v351_v34, %v280_v27 }
  0x4c   : > { %v389_v45 = vadd.f32 %v384_v18, %v380_v37  ;;  %v381_v46 = vadd.f32 %v359_v38, %v282_v35  ;;  %v382_v47 = vadd.f32 %v363_v39, %v283_v36  ;;  %v367_v48 = vrot.slane %v335_v40, %v338_v8 }
  0x4d   : > { %395 = vst.msk [vmem:[%s260_s29 + $0x8] sm:$0xff] %vm393_vm0, %v386_v41  ;;  %396 = vst.msk [vmem:[%s260_s29 + $0x10] sm:$0xff] %vm393_vm0, %v387_v42  ;;  %v388_v49 = vadd.f32 %v384_v18, %v379_v43 }
  0x4e   : > { %398 = vst.msk [vmem:[%s260_s29 + $0x20] sm:$0xff] %vm393_vm0, %v389_v45  ;;  %v390_v50 = vadd.f32 %v384_v18, %v381_v46  ;;  %v391_v51 = vadd.f32 %v384_v18, %v382_v47  ;;  %v383_v52 = vadd.f32 %v367_v48, %v284_v44 }
  0x4f   : > { %397 = vst.msk [vmem:[%s260_s29 + $0x18] sm:$0xff] %vm393_vm0, %v388_v49 }
  0x50   : > { %399 = vst.msk [vmem:[%s260_s29 + $0x28] sm:$0xff] %vm393_vm0, %v390_v50  ;;  %400 = vst.msk [vmem:[%s260_s29 + $0x30] sm:$0xff] %vm393_vm0, %v391_v51  ;;  %v392_v53 = vadd.f32 %v384_v18, %v383_v52 }
  0x52   : > { %401 = vst.msk [vmem:[%s260_s29 + $0x38] sm:$0xff] %vm393_vm0, %v392_v53 }
  0x53   : > { %670 = shalt.err (!%p667_p4)
}
  0x54   : > { %s671_s9 = scalar_lea.hbm %s921_s7, 1024  ;;  %s675_s24 = scalar_lea.hbm %s976_s3, 2048 }
  0x55   : > { %p672_p7 = scmp.ne.s32.totalorder %s921_s7, %s671_s9  ;;  %p676_p1 = scmp.lt.u32.totalorder %s921_s7, %s976_s3 }
  0x56   : > { %p677_p3 = scmp.lt.u32.totalorder %s675_s24, %s671_s9  ;;  %p679_p8 = scmp.lt.u32.totalorder %s671_s9, %s921_s7 }
  0x57   : > { %p673_p10 = pnand %p672_p7, %p984_p11 }
  0x58   : > { %p678_p9 = por %p677_p3, %p676_p1 }
  0x59   : > { %p674_p12 = pneg %p673_p10 }
  0x5a   : > { %p680_p0 = por %p679_p8, %p678_p9 }
  0x5c   : > { %p681_p6 = pnand %p680_p0, %p674_p12 }
  0x5e   : > { %684 = shalt.err (!%p681_p6)
}
  0x5f   : > { %s746_s29 = smov 128   ;;  %s747_s4 = smov 8  }
  0x60   : > { %562 = dma.vmem_to_hbm [thread:$0]  (%p984_p11), %s915_s30, 1024, %s921_s7, %s403_s18, %s746_s29, %s746_s29, %s747_s4  }
  0x61 PF: > { %s434_s5 = sand.u32 1, %s719_s12   ;;  %p985_p13 = scmp.ne.s32.totalorder %s981_s27, 0 }
  0x62   : > { %p986_p2 = scmp.ge.s32.totalorder %s739_s17, 2  ;;  %s435_s15 = scalar_lea.sflag [#allocation4], %s434_s5 }
  0x64   : > { %p569_p5 = pnand %p986_p2, %p985_p13 }
  0x66   : > { %714 = dma.done.wait (!%p569_p5), %s435_s15, 1024  }
  0x67   : > { %716 = vsyncadd (!%p569_p5), %s435_s15, 4294966272  ;;  %s19_s17 = sadd.s32 1, %s739_s17   ;;  %s987_s12 = smov %s723_s13 }
  0x68   : > { %p16_p4 = scmp.ge.s32.totalorder %s19_s17, 4   ;;  %s988_s13 = smov %s727_s14 }
  0x69   : > { %s989_s14 = smov %s824_s26  ;;  %s990_s15 = smov %s735_s16 }
  0x6a   : > { %s991_s16 = smov %s993_s20  ;;  %18 = sbr.rel (!%p16_p4) target bundleno = 6 (0x6), region = 83 }
  0x71   :  { %440 = vsyncpa [#allocation3], 1 }
  0x72   :  { %442 = vsyncpa [#allocation3 + $0x1], 1 }
  0x73   :  { %443 = vsyncpa [#allocation4], 1 }
  0x74   :  { %445 = vsyncpa [#allocation4 + $0x1], 1 }

</bundles_post_ra>
